<compile_context>
chip_gen: v7x
topology: tpu7x:2x2x1
jax: 0.10.0
libtpu: 0.0.40
codegen_flags: <defaults>
</compile_context>

<pallas_src>
import functools
import math

import jax
import jax.numpy as jnp
from jax.experimental import pallas as pl
from jax.experimental.pallas import tpu as pltpu

C_IN = 256
C_KQ = 128
C_V = 256
C_TOT = C_KQ + C_V + C_KQ  # 512 = fused K|V|Q output width


def _tct_kernel(x_ref, w_ref, b_ref, o_ref, *, valid_t, approx_recip):
    # x_ref: (BB, T_pad, 256) compute_dtype; w_ref: (256, 512) compute_dtype;
    # b_ref: (1, 512) f32; o_ref: (BB, T_pad, 256) out_dtype.
    bb, t_pad, _ = x_ref.shape
    mx_dtype = x_ref.dtype

    # Fused K/V/Q projection: one MXU matmul with M = BB*T_pad rows.  T_pad is
    # sublane-tile aligned so this reshape is a free relayout.
    x2 = x_ref[...].reshape(bb * t_pad, C_IN)
    y = jnp.dot(x2, w_ref[...], preferred_element_type=jnp.float32) + b_ref[...]
    y = y.reshape(bb, t_pad, C_TOT)

    # Static, lane-tile-aligned slices (0:128, 128:384, 384:512).
    # Slice-and-cast in one step; only V is kept in f32 (residual path).
    k = y[..., :C_KQ].astype(mx_dtype)                 # (BB, T, 128)
    v = y[..., C_KQ:C_KQ + C_V]                        # (BB, T, 256) f32
    q = y[..., C_KQ + C_V:].astype(mx_dtype)           # (BB, T, 128), pre-scaled

    # a[b, j, i] = sum_c K[b,j,c] * Q[b,i,c]  == (A / sqrt(128))^T per batch.
    # TODO(synk): for T < 128, pack several batch elements along the lane axis
    # with a block-diagonal mask so one dense matmul fills the MXU instead of
    # BB tiny (T,128)x(128,T) matmuls.
    a = jnp.einsum("bjc,bic->bji", k, q, preferred_element_type=jnp.float32)

    if valid_t != t_pad:
        # Mask padded key/query columns so the softmax matches the unpadded op.
        col = jax.lax.broadcasted_iota(jnp.int32, a.shape, dimension=2)
        a = jnp.where(col < valid_t, a, jnp.float32(-1e30))

    # PyTorch softmax(dim=1) == softmax over query index i == the LAST axis here.
    a = a - jnp.max(a, axis=-1, keepdims=True)
    e_f32 = jnp.exp(a)
    denom = jnp.sum(e_f32, axis=-1, keepdims=True)     # (BB, T, 1) f32

    # Deferred normalization: normalize AFTER the second matmul, so the VPU
    # multiply is O(BB*T*256) and the normalized (T,T) tensor never exists.
    e = e_f32.astype(mx_dtype)
    out_un = jnp.einsum("bji,bic->bjc", e, v.astype(mx_dtype),
                        preferred_element_type=jnp.float32)
    if approx_recip:
        recip = pl.reciprocal(denom, approx=True)      # EUP slot, bf16 path only
    else:
        recip = 1.0 / denom                            # exact on the f32 path

    o_ref[...] = (v + out_un * recip).astype(o_ref.dtype)


def _vmem_limit_bytes():
    # ~3/4 of physical VMEM: ≈96 MiB on v5e/v6e (128 MiB), ≈48 MiB on v7x (64 MiB).
    try:
        cap = int(pltpu.get_tpu_info().vmem_capacity_bytes)
        return max(32 << 20, min((cap * 3) // 4, 112 << 20))
    except Exception:
        return 48 << 20  # conservative fallback that fits every generation


def _choose_block_b(B, t_pad, compute_size, out_size, vmem_budget):
    """Bytes-aware batch blocking: bound live VMEM per grid step, not row count."""
    per_b = (
        2 * t_pad * C_IN * compute_size        # double-buffered input block
        + 2 * t_pad * C_V * out_size           # double-buffered output block
        + t_pad * C_TOT * 4                    # fused projection y (f32)
        + 2 * t_pad * C_KQ * compute_size      # k, q (compute dtype)
        + t_pad * C_V * (4 + compute_size)     # v f32 residual + compute copy
        + t_pad * t_pad * (4 + compute_size)   # logits (f32) + exp (compute)
        + t_pad * C_V * 4                      # unnormalized output (f32)
    )
    fixed = 2 * (C_IN * C_TOT * compute_size + C_TOT * 4)  # weights + bias
    usable = int(vmem_budget * 0.6) - fixed                # headroom for compiler
    bb = max(1, usable // max(per_b, 1))
    # TODO(synk): for very large T (even bb=1 overflowing, e.g. T >= ~2048 on
    # v7x's 64 MiB VMEM) tile the query axis with an online softmax.
    # TODO(synk): on v7x keep >= 2 "parallel" grid steps when B >= 2 (megacore);
    # on single-TC v5e/v6e fewer, bigger steps win, so no forced split here.
    return int(min(bb, B))


def temporal_cross_transformer(feat, params, *, compute_dtype=jnp.bfloat16,
                               out_dtype=jnp.float32, block_b=None,
                               return_batch_major=False):
    """feat: (T, 256, B) float32, matching the PyTorch module's input layout."""
    T, C, B = feat.shape
    assert C == C_IN
    compute_dtype = jnp.dtype(compute_dtype)
    out_dtype = jnp.dtype(out_dtype)
    exact = compute_dtype == jnp.dtype(jnp.float32)

    # Fused projection RHS: [Wk^T | Wv^T | Wq^T / sqrt(128)]  -> (256, 512),
    # with the attention scale folded into the Q columns / bias at trace time.
    inv_sqrt = 1.0 / math.sqrt(float(C_KQ))
    w_kvq = jnp.concatenate(
        [params["wk"].T, params["wv"].T, params["wq"].T * inv_sqrt], axis=1)
    b_kvq = jnp.concatenate(
        [params["bk"], params["bv"], params["bq"] * inv_sqrt]).reshape(1, C_TOT)

    # (T, 256, B) -> (B, T, 256): time on sublanes, channels on lanes.
    # TODO(synk): if the consumer can accept (B, T, 256) layout, this transpose
    # and the final one are pure HBM relayout passes and can be dropped.
    x = jnp.transpose(feat, (2, 0, 1)).astype(compute_dtype)
    w_kvq = w_kvq.astype(compute_dtype)
    b_kvq = b_kvq.astype(jnp.float32)      # bias added to the f32 accumulator

    # Pad T to the sublane tile for the compute dtype (8 f32 / 16 bf16) so the
    # in-kernel reshape stays free; padded columns are masked inside the kernel.
    t_align = 8 * max(1, 4 // compute_dtype.itemsize)
    t_pad = ((T + t_align - 1) // t_align) * t_align
    if t_pad != T:
        x = jnp.pad(x, ((0, 0), (0, t_pad - T), (0, 0)))

    vmem_budget = _vmem_limit_bytes()
    if block_b is None:
        block_b = _choose_block_b(B, t_pad, compute_dtype.itemsize,
                                  out_dtype.itemsize, vmem_budget)
    block_b = max(1, min(int(block_b), B))
    num_blocks = pl.cdiv(B, block_b)
    b_pad = num_blocks * block_b
    if b_pad != B:
        x = jnp.pad(x, ((0, b_pad - B), (0, 0), (0, 0)))

    kernel = functools.partial(_tct_kernel, valid_t=T, approx_recip=not exact)

    out = pl.pallas_call(
        kernel,
        out_shape=jax.ShapeDtypeStruct((b_pad, t_pad, C_V), out_dtype),
        grid_spec=pltpu.PrefetchScalarGridSpec(
            num_scalar_prefetch=0,
            grid=(num_blocks,),
            in_specs=[
                pl.BlockSpec((block_b, t_pad, C_IN), lambda g: (g, 0, 0)),
                pl.BlockSpec((C_IN, C_TOT), lambda g: (0, 0)),   # fused weights
                pl.BlockSpec((1, C_TOT), lambda g: (0, 0)),      # fused bias
            ],
            out_specs=pl.BlockSpec((block_b, t_pad, C_V), lambda g: (g, 0, 0)),
        ),
        compiler_params=pltpu.CompilerParams(
            dimension_semantics=("parallel",),
            vmem_limit_bytes=int(vmem_budget)),
    )(x, w_kvq, b_kvq)

    out = out[:B, :T]
    if return_batch_major:
        return out                         # (B, T, 256): skips one HBM transpose
    # (B, T, 256) -> (T, 256, B) to match value.permute(2,1,0) + out.permute(2,1,0).
    return jnp.transpose(out, (1, 2, 0))


def _reference(feat, params):
    """Pure-JAX f32 reference of the PyTorch forward."""
    x = jnp.transpose(feat, (2, 1, 0))                      # (B, 256, T)
    conv = lambda w, b: jnp.einsum("oc,bct->bot", w, x) + b[None, :, None]
    key = conv(params["wk"], params["bk"])                  # (B, 128, T)
    val = conv(params["wv"], params["bv"])                  # (B, 256, T)
    qry = conv(params["wq"], params["bq"])                  # (B, 128, T)
    A = jnp.einsum("bct,bcs->bts", qry, key) / math.sqrt(C_KQ)
    A = jax.nn.softmax(A, axis=1)
    out = jnp.einsum("bct,bts->bcs", val, A)                # (B, 256, T)
    return jnp.transpose(val, (2, 1, 0)) + jnp.transpose(out, (2, 1, 0))


def _init_params(key):
    # Deterministic init mimicking PyTorch Conv1d default (uniform +/- 1/sqrt(fan_in)).
    ks = jax.random.split(key, 6)
    bound = 1.0 / math.sqrt(C_IN)
    u = lambda k, shape: jax.random.uniform(k, shape, jnp.float32, -bound, bound)
    return {
        "wk": u(ks[0], (C_KQ, C_IN)), "bk": u(ks[1], (C_KQ,)),
        "wv": u(ks[2], (C_V, C_IN)),  "bv": u(ks[3], (C_V,)),
        "wq": u(ks[4], (C_KQ, C_IN)), "bq": u(ks[5], (C_KQ,)),
    }


if __name__ == "__main__":
    key = jax.random.PRNGKey(0)
    k_feat, k_params = jax.random.split(key)
    params = _init_params(k_params)

    # Two shapes: one tile-aligned, one exercising the T-padding/mask path.
    for (T, B) in [(8, 2), (12, 3)]:
        feat = jax.random.normal(jax.random.fold_in(k_feat, 100 * T + B),
                                 (T, C_IN, B), dtype=jnp.float32)
        ref = _reference(feat, params)

        # Exact mode (f32 MXU operands, exact reciprocal): semantics check.
        out_f32 = jax.block_until_ready(
            temporal_cross_transformer(feat, params, compute_dtype=jnp.float32))
        assert out_f32.shape == (T, C_V, B), out_f32.shape
        assert jnp.allclose(out_f32, ref, atol=5e-3, rtol=5e-3), (
            "f32 path mismatch (T=%d,B=%d), max abs err = %g"
            % (T, B, float(jnp.max(jnp.abs(out_f32 - ref)))))

        # Default fast path (bf16 MXU operands, f32 accumulation).
        out_fast = jax.block_until_ready(temporal_cross_transformer(feat, params))
        assert out_fast.shape == (T, C_V, B), out_fast.shape
        assert jnp.allclose(out_fast, ref, atol=5e-2, rtol=5e-2), (
            "bf16 path mismatch (T=%d,B=%d), max abs err = %g"
            % (T, B, float(jnp.max(jnp.abs(out_fast - ref)))))

    # Multi-grid-step + batch-padding path (explicit block_b override).
    T, B = 12, 3
    feat = jax.random.normal(jax.random.fold_in(k_feat, 7), (T, C_IN, B),
                             dtype=jnp.float32)
    ref = _reference(feat, params)
    out_blk = jax.block_until_ready(
        temporal_cross_transformer(feat, params, compute_dtype=jnp.float32,
                                   block_b=2))
    assert jnp.allclose(out_blk, ref, atol=5e-3, rtol=5e-3), (
        "blocked path mismatch, max abs err = %g"
        % float(jnp.max(jnp.abs(out_blk - ref))))

    print("KERNEL_OK")
</pallas_src>

<mosaic_0001>
module attributes {stable_mosaic.version = 11 : i64} {
  func.func @_tct_kernel(%arg0: i32, %arg1: memref<2x8x256xf32, #tpu.memory_space<vmem>>, %arg2: memref<256x512xf32, #tpu.memory_space<vmem>>, %arg3: memref<1x512xf32, #tpu.memory_space<vmem>>, %arg4: memref<2x8x256xf32, #tpu.memory_space<vmem>>) attributes {dimension_semantics = [#tpu.dimension_semantics<parallel>], iteration_bounds = array<i64: 1>, scalar_prefetch = 0 : i64, scratch_operands = 0 : i64, tpu.core_type = #tpu.core_type<tc>, window_params = [{transform_indices = @transform_0, window_bounds = array<i64: 2, 8, 256>}, {pipeline_mode = #tpu.pipeline_mode<synchronous>, transform_indices = @transform_1, window_bounds = array<i64: 256, 512>}, {pipeline_mode = #tpu.pipeline_mode<synchronous>, transform_indices = @transform_2, window_bounds = array<i64: 1, 512>}, {transform_indices = @transform_3, window_bounds = array<i64: 2, 8, 256>}]} {
    %c0 = arith.constant 0 : index
    %c0_0 = arith.constant 0 : index
    %c0_1 = arith.constant 0 : index
    %0 = vector.load %arg1[%c0, %c0_0, %c0_1] : memref<2x8x256xf32, #tpu.memory_space<vmem>>, vector<2x8x256xf32>
    %1 = vector.shape_cast %0 : vector<2x8x256xf32> to vector<16x256xf32>
    %c0_2 = arith.constant 0 : index
    %c0_3 = arith.constant 0 : index
    %2 = vector.load %arg2[%c0_2, %c0_3] : memref<256x512xf32, #tpu.memory_space<vmem>>, vector<256x512xf32>
    %cst = arith.constant dense<0.000000e+00> : vector<16x512xf32>
    %3 = tpu.matmul %1, %2, %cst {dimension_numbers = #tpu.dot_dimension_numbers<[1], [0], [0], [1], [0, 0, 1, 1], [], []>} : vector<16x256xf32>, vector<256x512xf32>, vector<16x512xf32> -> vector<16x512xf32>
    %c0_4 = arith.constant 0 : index
    %c0_5 = arith.constant 0 : index
    %4 = vector.load %arg3[%c0_4, %c0_5] : memref<1x512xf32, #tpu.memory_space<vmem>>, vector<1x512xf32>
    %5 = vector.broadcast %4 : vector<1x512xf32> to vector<16x512xf32>
    %6 = arith.addf %3, %5 : vector<16x512xf32>
    %7 = vector.shape_cast %6 : vector<16x512xf32> to vector<2x8x512xf32>
    %8 = vector.extract_strided_slice %7 {offsets = [0, 0, 0], sizes = [2, 8, 128], strides = [1, 1, 1]} : vector<2x8x512xf32> to vector<2x8x128xf32>
    %9 = vector.extract_strided_slice %7 {offsets = [0, 0, 128], sizes = [2, 8, 256], strides = [1, 1, 1]} : vector<2x8x512xf32> to vector<2x8x256xf32>
    %10 = vector.extract_strided_slice %7 {offsets = [0, 0, 384], sizes = [2, 8, 128], strides = [1, 1, 1]} : vector<2x8x512xf32> to vector<2x8x128xf32>
    "tpu.trace_start"() <{level = 10 : i32, message = "bjc,bic->bji"}> : () -> ()
    %cst_6 = arith.constant dense<0.000000e+00> : vector<2x8x8xf32>
    %11 = tpu.matmul %8, %10, %cst_6 {dimension_numbers = #tpu.dot_dimension_numbers<[2], [2], [1], [1], [0, 0, 0, 1, 1, 1], [0], [0]>} : vector<2x8x128xf32>, vector<2x8x128xf32>, vector<2x8x8xf32> -> vector<2x8x8xf32>
    "tpu.trace_stop"() : () -> ()
    %cst_7 = arith.constant dense<0xFF800000> : vector<2x8xf32>
    %12 = vector.multi_reduction <maximumf>, %11, %cst_7 [2] : vector<2x8x8xf32> to vector<2x8xf32>
    %13 = vector.shape_cast %12 : vector<2x8xf32> to vector<2x8x1xf32>
    %14 = vector.broadcast %13 : vector<2x8x1xf32> to vector<2x8x8xf32>
    %15 = arith.subf %11, %14 : vector<2x8x8xf32>
    %16 = math.exp %15 : vector<2x8x8xf32>
    %cst_8 = arith.constant dense<0.000000e+00> : vector<2x8xf32>
    %17 = vector.multi_reduction <add>, %16, %cst_8 [2] : vector<2x8x8xf32> to vector<2x8xf32>
    %18 = vector.shape_cast %17 : vector<2x8xf32> to vector<2x8x1xf32>
    "tpu.trace_start"() <{level = 10 : i32, message = "bji,bic->bjc"}> : () -> ()
    %cst_9 = arith.constant dense<0.000000e+00> : vector<2x8x256xf32>
    %19 = tpu.matmul %16, %9, %cst_9 {dimension_numbers = #tpu.dot_dimension_numbers<[2], [1], [1], [2], [0, 0, 0, 1, 1, 2], [0], [0]>} : vector<2x8x8xf32>, vector<2x8x256xf32>, vector<2x8x256xf32> -> vector<2x8x256xf32>
    "tpu.trace_stop"() : () -> ()
    %cst_10 = arith.constant 1.000000e+00 : f32
    %20 = vector.broadcast %cst_10 : f32 to vector<2x8x1xf32>
    %21 = arith.divf %20, %18 : vector<2x8x1xf32>
    %22 = vector.broadcast %21 : vector<2x8x1xf32> to vector<2x8x256xf32>
    %23 = arith.mulf %19, %22 : vector<2x8x256xf32>
    %24 = arith.addf %9, %23 : vector<2x8x256xf32>
    %c0_11 = arith.constant 0 : index
    %c0_12 = arith.constant 0 : index
    %c0_13 = arith.constant 0 : index
    %25 = vector.load %arg4[%c0_11, %c0_12, %c0_13] : memref<2x8x256xf32, #tpu.memory_space<vmem>>, vector<2x8x256xf32>
    tpu.vector_store %arg4[%c0_11, %c0_12, %c0_13], %24 {strides = array<i32>} : memref<2x8x256xf32, #tpu.memory_space<vmem>>, vector<2x8x256xf32>,
    return
  }
  func.func @transform_0(%arg0: i32) -> (i32, i32, i32) {
    %c0_i32 = arith.constant 0 : i32
    %c0_i32_0 = arith.constant 0 : i32
    %c0_i32_1 = arith.constant 0 : i32
    return %arg0, %c0_i32, %c0_i32_0 : i32, i32, i32
  }
  func.func @transform_1(%arg0: i32) -> (i32, i32) {
    %c0_i32 = arith.constant 0 : i32
    %c0_i32_0 = arith.constant 0 : i32
    %c0_i32_1 = arith.constant 0 : i32
    return %c0_i32, %c0_i32_0 : i32, i32
  }
  func.func @transform_2(%arg0: i32) -> (i32, i32) {
    %c0_i32 = arith.constant 0 : i32
    %c0_i32_0 = arith.constant 0 : i32
    %c0_i32_1 = arith.constant 0 : i32
    return %c0_i32, %c0_i32_0 : i32, i32
  }
  func.func @transform_3(%arg0: i32) -> (i32, i32, i32) {
    %c0_i32 = arith.constant 0 : i32
    %c0_i32_0 = arith.constant 0 : i32
    %c0_i32_1 = arith.constant 0 : i32
    return %arg0, %c0_i32, %c0_i32_0 : i32, i32, i32
  }
}

</mosaic_0001>

<bundles_post_ra>
// kernel: tpu_custom_call.1
= control target key start
LH: loop header
LB: loop body
LE: loop exit
PB: predicated region body
PF: predicated region fallthrough
CT: control target
= control target key end

     0   :  { %8 = vsyncpa [#allocation3], 0  ;;  %s1005_s0 = inlined_call_operand.hbm [shape: f32[2,8,256], index: 0, kind: input, shape index: {}]   ;;  %s1006_s1 = inlined_call_operand.hbm [shape: f32[256,512], index: 1, kind: input, shape index: {}]   ;;  %s1007_s2 = inlined_call_operand.vmem [shape: f32[1,512], index: 2, kind: input, shape index: {}]   ;;  %s1008_s3 = inlined_call_operand.hbm [shape: f32[2,8,256], index: 3, kind: output, shape index: {}]  }
   0x1   :  { %9 = vsyncpa [#allocation6], 0 }
   0x2   :  { %10 = vsyncpa [#allocation4], 0  ;;  %s925_s12 = smov [#allocation2]   ;;  %s853_s16 = scalar_lea.hbm %s1005_s0, 512 }
   0x3   :  { %s16_s13 = sshll.u32 %s925_s12, 4  ;;  %p854_p0 = scmp.ne.s32.totalorder %s1005_s0, %s853_s16  ;;  %s17_s13 = int_to_ptr.vmem [resolvable:$true] %s16_s13 }
   0x4   :  { %p857_p1 = scmp.lt.u32.totalorder %s853_s16, %s1005_s0 }
   0x6   :  { %p859_p2 = pnand %p857_p1, %p854_p0 }
   0x8   :  { %862 = shalt.err (!%p859_p2)
}
   0x9   :  { %s863_s21 = scalar_lea.vmem %s17_s13, 512  ;;  %p868_p4 = scmp.lt.s32.totalorder %s17_s13, %s17_s13 }
   0xa   :  { %p864_p3 = scmp.ne.s32.totalorder %s17_s13, %s863_s21  ;;  %p869_p5 = scmp.lt.s32.totalorder %s863_s21, %s863_s21 }
   0xc   :  { %p870_p6 = por %p869_p5, %p868_p4 }
   0xe   :  { %p871_p7 = pnand %p870_p6, %p864_p3 }
  0x10   :  { %874 = shalt.err (!%p871_p7)
}
  0x11   :  { %s926_s22 = smov 256   ;;  %s927_s23 = smov 16  }
  0x12   :  { %22 = dma.hbm_to_vmem [thread:$0]  %s1005_s0, 512, %s17_s13, [#allocation3], %s926_s22, %s926_s22, %s927_s23  }
  0x13   :  { %s928_s26 = smov [#allocation5]   ;;  %s875_s30 = scalar_lea.hbm %s1006_s1, 16384 }
  0x14   :  { %s28_s27 = sshll.u32 %s928_s26, 4  ;;  %p876_p8 = scmp.ne.s32.totalorder %s1006_s1, %s875_s30  ;;  %s29_s27 = int_to_ptr.vmem [resolvable:$true] %s28_s27 }
  0x15   :  { %p879_p9 = scmp.lt.u32.totalorder %s875_s30, %s1006_s1 }
  0x17   :  { %p881_p10 = pnand %p879_p9, %p876_p8 }
  0x19   :  { %884 = shalt.err (!%p881_p10)
}
  0x1a   :  { %s885_s8 = scalar_lea.vmem %s29_s27, 16384  ;;  %p890_p12 = scmp.lt.s32.totalorder %s29_s27, %s29_s27 }
  0x1b   :  { %p886_p11 = scmp.ne.s32.totalorder %s29_s27, %s885_s8  ;;  %p891_p13 = scmp.lt.s32.totalorder %s885_s8, %s885_s8 }
  0x1d   :  { %p892_p0 = por %p891_p13, %p890_p12 }
  0x1f   :  { %p893_p1 = pnand %p892_p0, %p886_p11 }
  0x21   :  { %896 = shalt.err (!%p893_p1)
}
  0x22   :  { %s929_s0 = smov 512   ;;  %s930_s9 = smov 32  }
  0x23   :  { %34 = dma.hbm_to_vmem [thread:$0]  %s1006_s1, 16384, %s29_s27, [#allocation6], %s929_s0, %s929_s0, %s930_s9  }
  0x24   :  { %919 = dma.done.wait [#allocation3], 512  }
  0x25   :  { %920 = vsyncadd [#allocation3], 4294966784 }
  0x26   :  { %921 = dma.done.wait [#allocation6], 16384  }
  0x27   :  { %922 = vsyncadd [#allocation6], 4294950912  ;;  %v50_v0 = vld [vmem:[#allocation5 + $0x18] sm:$0xff]  ;;  %v49_v2 = vld [vmem:[#allocation5 + $0x10] sm:$0xff]  ;;  %vm932_vm0 = vmmov 0   ;;  %vm491_vm1 = vcmask 64512  }
  0x28   :  { %v54_v1 = vld [vmem:[#allocation5 + $0x38] sm:$0xff]  ;;  %v53_v4 = vld [vmem:[#allocation5 + $0x30] sm:$0xff]  ;;  %v48_v5 = vld [vmem:[#allocation5 + $0x8] sm:$0xff] }
  0x29   :  { %v772_v3 = vpack.c.bf16 %v54_v1, %v50_v0  ;;  %v52_v6 = vld [vmem:[#allocation5 + $0x28] sm:$0xff]  ;;  %v774_v7 = vpack.c.bf16 %v53_v4, %v49_v2  ;;  %v58_v9 = vld [vmem:[#allocation5 + $0x58] sm:$0xff]  ;;  %v47_v11 = vld [vmem:[#allocation5] sm:$0xff] }
  0x2a   :  { %v708_v8 = vpack.c.bf16 %v52_v6, %v48_v5  ;;  %v62_v10 = vld [vmem:[#allocation5 + $0x78] sm:$0xff]  ;;  %v51_v13 = vld [vmem:[#allocation5 + $0x20] sm:$0xff]  ;;  %v57_v14 = vld [vmem:[#allocation5 + $0x50] sm:$0xff] }
  0x2b   :  { %773 = vmatprep.subr.bf16.mxu1 %v772_v3  ;;  %v776_v12 = vpack.c.bf16 %v62_v10, %v58_v9  ;;  %v61_v15 = vld [vmem:[#allocation5 + $0x70] sm:$0xff]  ;;  %v710_v16 = vpack.c.bf16 %v51_v13, %v47_v11  ;;  %v56_v18 = vld [vmem:[#allocation5 + $0x48] sm:$0xff]  ;;  %v66_v20 = vld [vmem:[#allocation5 + $0x98] sm:$0xff] }
  0x2c   :  { %775 = vmatpush1.bf16.msra.mxu1 %v774_v7  ;;  %709 = vmatprep.subr.bf16.mxu0 %v708_v8  ;;  %v778_v17 = vpack.c.bf16 %v61_v15, %v57_v14  ;;  %v60_v19 = vld [vmem:[#allocation5 + $0x68] sm:$0xff]  ;;  %v70_v22 = vld [vmem:[#allocation5 + $0xb8] sm:$0xff]  ;;  %v55_v23 = vld [vmem:[#allocation5 + $0x40] sm:$0xff] }
  0x2d   :  { %777 = vmatprep.subr.bf16.mxu1 %v776_v12  ;;  %v712_v21 = vpack.c.bf16 %v60_v19, %v56_v18  ;;  %v59_v24 = vld [vmem:[#allocation5 + $0x60] sm:$0xff]  ;;  %711 = vmatpush1.bf16.msra.mxu0 %v710_v16  ;;  %v780_v25 = vpack.c.bf16 %v70_v22, %v66_v20  ;;  %v65_v27 = vld [vmem:[#allocation5 + $0x90] sm:$0xff]  ;;  %v64_v29 = vld [vmem:[#allocation5 + $0x88] sm:$0xff] }
  0x2e   :  { %v714_v26 = vpack.c.bf16 %v59_v24, %v55_v23  ;;  %v69_v28 = vld [vmem:[#allocation5 + $0xb0] sm:$0xff]  ;;  %v68_v30 = vld [vmem:[#allocation5 + $0xa8] sm:$0xff]  ;;  %v74_v31 = vld [vmem:[#allocation5 + $0xd8] sm:$0xff] }
  0x2f   :  { %713 = vmatprep.subr.bf16.mxu0 %v712_v21  ;;  %v78_v32 = vld [vmem:[#allocation5 + $0xf8] sm:$0xff]  ;;  %v782_v33 = vpack.c.bf16 %v69_v28, %v65_v27  ;;  %v716_v34 = vpack.c.bf16 %v68_v30, %v64_v29  ;;  %v63_v35 = vld [vmem:[#allocation5 + $0x80] sm:$0xff]  ;;  %v73_v37 = vld [vmem:[#allocation5 + $0xd0] sm:$0xff] }
  0x30   :  { %779 = vmatpush1.bf16.msra.mxu1 %v778_v17  ;;  %v67_v36 = vld [vmem:[#allocation5 + $0xa0] sm:$0xff]  ;;  %v784_v38 = vpack.c.bf16 %v78_v32, %v74_v31  ;;  %v77_v39 = vld [vmem:[#allocation5 + $0xf0] sm:$0xff]  ;;  %v72_v40 = vld [vmem:[#allocation5 + $0xc8] sm:$0xff] }
  0x31   :  { %781 = vmatprep.subr.bf16.mxu1 %v780_v25  ;;  %v76_v41 = vld [vmem:[#allocation5 + $0xe8] sm:$0xff]  ;;  %715 = vmatpush1.bf16.msra.mxu0 %v714_v26  ;;  %v718_v42 = vpack.c.bf16 %v67_v36, %v63_v35  ;;  %v82_v43 = vld [vmem:[#allocation5 + $0x118] sm:$0xff]  ;;  %v71_v46 = vld [vmem:[#allocation5 + $0xc0] sm:$0xff]  ;;  %v786_v48 = vpack.c.bf16 %v77_v39, %v73_v37 }
  0x32   :  { %v86_v44 = vld [vmem:[#allocation5 + $0x138] sm:$0xff]  ;;  %717 = vmatprep.subr.bf16.mxu0 %v716_v34  ;;  %v720_v45 = vpack.c.bf16 %v76_v41, %v72_v40  ;;  %v75_v47 = vld [vmem:[#allocation5 + $0xe0] sm:$0xff]  ;;  %v80_v49 = vld [vmem:[#allocation5 + $0x108] sm:$0xff] }
  0x33   :  { %v84_v50 = vld [vmem:[#allocation5 + $0x128] sm:$0xff]  ;;  %v788_v51 = vpack.c.bf16 %v86_v44, %v82_v43  ;;  %v81_v52 = vld [vmem:[#allocation5 + $0x110] sm:$0xff]  ;;  %v722_v54 = vpack.c.bf16 %v75_v47, %v71_v46  ;;  %v90_v55 = vld [vmem:[#allocation5 + $0x158] sm:$0xff] }
  0x34   :  { %783 = vmatpush1.bf16.msra.mxu1 %v782_v33  ;;  %v85_v53 = vld [vmem:[#allocation5 + $0x130] sm:$0xff]  ;;  %v94_v56 = vld [vmem:[#allocation5 + $0x178] sm:$0xff]  ;;  %v724_v57 = vpack.c.bf16 %v84_v50, %v80_v49  ;;  %v79_v58 = vld [vmem:[#allocation5 + $0x100] sm:$0xff] }
  0x35   :  { %785 = vmatprep.subr.bf16.mxu1 %v784_v38  ;;  %719 = vmatpush1.bf16.msra.mxu0 %v718_v42  ;;  %v83_v59 = vld [vmem:[#allocation5 + $0x120] sm:$0xff]  ;;  %v790_v60 = vpack.c.bf16 %v85_v53, %v81_v52  ;;  %v88_v61 = vld [vmem:[#allocation5 + $0x148] sm:$0xff]  ;;  %v792_v63 = vpack.c.bf16 %v94_v56, %v90_v55  ;;  %v89_v0 = vld [vmem:[#allocation5 + $0x150] sm:$0xff] }
  0x36   :  { %721 = vmatprep.subr.bf16.mxu0 %v720_v45  ;;  %v92_v62 = vld [vmem:[#allocation5 + $0x168] sm:$0xff]  ;;  %v93_v1 = vld [vmem:[#allocation5 + $0x170] sm:$0xff]  ;;  %v726_v2 = vpack.c.bf16 %v83_v59, %v79_v58  ;;  %v98_v3 = vld [vmem:[#allocation5 + $0x198] sm:$0xff] }
  0x37   :  { %v102_v4 = vld [vmem:[#allocation5 + $0x1b8] sm:$0xff]  ;;  %v728_v5 = vpack.c.bf16 %v92_v62, %v88_v61  ;;  %v87_v6 = vld [vmem:[#allocation5 + $0x140] sm:$0xff]  ;;  %v794_v8 = vpack.c.bf16 %v93_v1, %v89_v0  ;;  %v96_v9 = vld [vmem:[#allocation5 + $0x188] sm:$0xff] }
  0x38   :  { %787 = vmatpush1.bf16.msra.mxu1 %v786_v48  ;;  %v91_v7 = vld [vmem:[#allocation5 + $0x160] sm:$0xff]  ;;  %v100_v10 = vld [vmem:[#allocation5 + $0x1a8] sm:$0xff]  ;;  %v796_v11 = vpack.c.bf16 %v102_v4, %v98_v3  ;;  %v97_v12 = vld [vmem:[#allocation5 + $0x190] sm:$0xff] }
  0x39   :  { %789 = vmatprep.subr.bf16.mxu1 %v788_v51  ;;  %723 = vmatpush1.bf16.msra.mxu0 %v722_v54  ;;  %v101_v13 = vld [vmem:[#allocation5 + $0x1b0] sm:$0xff]  ;;  %v730_v14 = vpack.c.bf16 %v91_v7, %v87_v6  ;;  %v106_v15 = vld [vmem:[#allocation5 + $0x1d8] sm:$0xff]  ;;  %v732_v17 = vpack.c.bf16 %v100_v10, %v96_v9  ;;  %v95_v18 = vld [vmem:[#allocation5 + $0x180] sm:$0xff] }
  0x3a   :  { %725 = vmatprep.subr.bf16.mxu0 %v724_v57  ;;  %v110_v16 = vld [vmem:[#allocation5 + $0x1f8] sm:$0xff]  ;;  %v99_v19 = vld [vmem:[#allocation5 + $0x1a0] sm:$0xff]  ;;  %v798_v20 = vpack.c.bf16 %v101_v13, %v97_v12  ;;  %v104_v21 = vld [vmem:[#allocation5 + $0x1c8] sm:$0xff] }
  0x3b   :  { %v108_v22 = vld [vmem:[#allocation5 + $0x1e8] sm:$0xff]  ;;  %v800_v23 = vpack.c.bf16 %v110_v16, %v106_v15  ;;  %v105_v24 = vld [vmem:[#allocation5 + $0x1d0] sm:$0xff]  ;;  %v734_v26 = vpack.c.bf16 %v99_v19, %v95_v18  ;;  %v114_v27 = vld [vmem:[#allocation5 + $0x218] sm:$0xff] }
  0x3c   :  { %791 = vmatpush1.bf16.msra.mxu1 %v790_v60  ;;  %v109_v25 = vld [vmem:[#allocation5 + $0x1f0] sm:$0xff]  ;;  %v118_v28 = vld [vmem:[#allocation5 + $0x238] sm:$0xff]  ;;  %v736_v29 = vpack.c.bf16 %v108_v22, %v104_v21  ;;  %v103_v30 = vld [vmem:[#allocation5 + $0x1c0] sm:$0xff] }
  0x3d   :  { %793 = vmatprep.subr.bf16.mxu1 %v792_v63  ;;  %727 = vmatpush1.bf16.msra.mxu0 %v726_v2  ;;  %v107_v31 = vld [vmem:[#allocation5 + $0x1e0] sm:$0xff]  ;;  %v802_v32 = vpack.c.bf16 %v109_v25, %v105_v24  ;;  %v112_v33 = vld [vmem:[#allocation5 + $0x208] sm:$0xff]  ;;  %v804_v35 = vpack.c.bf16 %v118_v28, %v114_v27  ;;  %v113_v36 = vld [vmem:[#allocation5 + $0x210] sm:$0xff] }
  0x3e   :  { %729 = vmatprep.subr.bf16.mxu0 %v728_v5  ;;  %v116_v34 = vld [vmem:[#allocation5 + $0x228] sm:$0xff]  ;;  %v117_v37 = vld [vmem:[#allocation5 + $0x230] sm:$0xff]  ;;  %v738_v38 = vpack.c.bf16 %v107_v31, %v103_v30  ;;  %v122_v39 = vld [vmem:[#allocation5 + $0x258] sm:$0xff] }
  0x3f   :  { %v126_v40 = vld [vmem:[#allocation5 + $0x278] sm:$0xff]  ;;  %v740_v41 = vpack.c.bf16 %v116_v34, %v112_v33  ;;  %v111_v42 = vld [vmem:[#allocation5 + $0x200] sm:$0xff]  ;;  %v806_v44 = vpack.c.bf16 %v117_v37, %v113_v36  ;;  %v120_v45 = vld [vmem:[#allocation5 + $0x248] sm:$0xff] }
  0x40   :  { %795 = vmatpush1.bf16.msra.mxu1 %v794_v8  ;;  %v115_v43 = vld [vmem:[#allocation5 + $0x220] sm:$0xff]  ;;  %v124_v46 = vld [vmem:[#allocation5 + $0x268] sm:$0xff]  ;;  %v808_v47 = vpack.c.bf16 %v126_v40, %v122_v39  ;;  %v121_v48 = vld [vmem:[#allocation5 + $0x250] sm:$0xff] }
  0x41   :  { %797 = vmatprep.subr.bf16.mxu1 %v796_v11  ;;  %731 = vmatpush1.bf16.msra.mxu0 %v730_v14  ;;  %v125_v49 = vld [vmem:[#allocation5 + $0x270] sm:$0xff]  ;;  %v742_v50 = vpack.c.bf16 %v115_v43, %v111_v42  ;;  %v130_v51 = vld [vmem:[#allocation5 + $0x298] sm:$0xff]  ;;  %v744_v53 = vpack.c.bf16 %v124_v46, %v120_v45  ;;  %v119_v54 = vld [vmem:[#allocation5 + $0x240] sm:$0xff] }
  0x42   :  { %733 = vmatprep.subr.bf16.mxu0 %v732_v17  ;;  %v134_v52 = vld [vmem:[#allocation5 + $0x2b8] sm:$0xff]  ;;  %v123_v55 = vld [vmem:[#allocation5 + $0x260] sm:$0xff]  ;;  %v810_v56 = vpack.c.bf16 %v125_v49, %v121_v48  ;;  %v128_v57 = vld [vmem:[#allocation5 + $0x288] sm:$0xff] }
  0x43   :  { %v132_v58 = vld [vmem:[#allocation5 + $0x2a8] sm:$0xff]  ;;  %v812_v59 = vpack.c.bf16 %v134_v52, %v130_v51  ;;  %v129_v60 = vld [vmem:[#allocation5 + $0x290] sm:$0xff]  ;;  %v746_v62 = vpack.c.bf16 %v123_v55, %v119_v54  ;;  %v138_v63 = vld [vmem:[#allocation5 + $0x2d8] sm:$0xff] }
  0x44   :  { %799 = vmatpush1.bf16.msra.mxu1 %v798_v20  ;;  %v133_v61 = vld [vmem:[#allocation5 + $0x2b0] sm:$0xff]  ;;  %v142_v0 = vld [vmem:[#allocation5 + $0x2f8] sm:$0xff]  ;;  %v748_v1 = vpack.c.bf16 %v132_v58, %v128_v57  ;;  %v127_v2 = vld [vmem:[#allocation5 + $0x280] sm:$0xff] }
  0x45   :  { %801 = vmatprep.subr.bf16.mxu1 %v800_v23  ;;  %735 = vmatpush1.bf16.msra.mxu0 %v734_v26  ;;  %v131_v3 = vld [vmem:[#allocation5 + $0x2a0] sm:$0xff]  ;;  %v814_v4 = vpack.c.bf16 %v133_v61, %v129_v60  ;;  %v136_v5 = vld [vmem:[#allocation5 + $0x2c8] sm:$0xff]  ;;  %v816_v7 = vpack.c.bf16 %v142_v0, %v138_v63  ;;  %v137_v8 = vld [vmem:[#allocation5 + $0x2d0] sm:$0xff] }
  0x46   :  { %737 = vmatprep.subr.bf16.mxu0 %v736_v29  ;;  %v140_v6 = vld [vmem:[#allocation5 + $0x2e8] sm:$0xff]  ;;  %v141_v9 = vld [vmem:[#allocation5 + $0x2f0] sm:$0xff]  ;;  %v750_v11 = vpack.c.bf16 %v131_v3, %v127_v2  ;;  %v146_v12 = vld [vmem:[#allocation5 + $0x318] sm:$0xff] }
  0x47   :  { %v44_v10 = vld [vmem:[#allocation2 + $0x8] sm:$0xff]  ;;  %v150_v13 = vld [vmem:[#allocation5 + $0x338] sm:$0xff]  ;;  %v752_v14 = vpack.c.bf16 %v140_v6, %v136_v5  ;;  %v135_v15 = vld [vmem:[#allocation5 + $0x2c0] sm:$0xff]  ;;  %v818_v17 = vpack.c.bf16 %v141_v9, %v137_v8  ;;  %v177_v5 = vlaneseq }
  0x48   :  { %803 = vmatpush1.bf16.msra.mxu1 %v802_v32  ;;  %338 = vmatprep.mubr.f32.mxu1 %v44_v10  ;;  %v139_v16 = vld [vmem:[#allocation5 + $0x2e0] sm:$0xff]  ;;  %v144_v18 = vld [vmem:[#allocation5 + $0x308] sm:$0xff]  ;;  %v820_v20 = vpack.c.bf16 %v150_v13, %v146_v12  ;;  %v145_v21 = vld [vmem:[#allocation5 + $0x310] sm:$0xff] }
  0x49   :  { %805 = vmatprep.subr.bf16.mxu1 %v804_v35  ;;  %739 = vmatpush1.bf16.msra.mxu0 %v738_v38  ;;  %v148_v19 = vld [vmem:[#allocation5 + $0x328] sm:$0xff]  ;;  %v149_v22 = vld [vmem:[#allocation5 + $0x330] sm:$0xff]  ;;  %v754_v23 = vpack.c.bf16 %v139_v16, %v135_v15  ;;  %v154_v24 = vld [vmem:[#allocation5 + $0x358] sm:$0xff]  ;;  %v178_v6 = vshrl.u32 %v177_v5, 7 }
  0x4a   :  { %741 = vmatprep.subr.bf16.mxu0 %v740_v41  ;;  %261 = vmatprep.mubr.f32.mxu0 %v44_v10  ;;  %v158_v25 = vld [vmem:[#allocation5 + $0x378] sm:$0xff]  ;;  %v756_v26 = vpack.c.bf16 %v148_v19, %v144_v18  ;;  %v143_v27 = vld [vmem:[#allocation5 + $0x300] sm:$0xff]  ;;  %v822_v29 = vpack.c.bf16 %v149_v22, %v145_v21  ;;  %v152_v30 = vld [vmem:[#allocation5 + $0x348] sm:$0xff] }
  0x4b   :  { %v147_v28 = vld [vmem:[#allocation5 + $0x320] sm:$0xff]  ;;  %v156_v31 = vld [vmem:[#allocation5 + $0x368] sm:$0xff]  ;;  %v824_v32 = vpack.c.bf16 %v158_v25, %v154_v24  ;;  %v153_v33 = vld [vmem:[#allocation5 + $0x350] sm:$0xff]  ;;  %v187_v9 = vsub.s32 2, %v178_v6  ;;  %v179_v10 = vsub.s32 0, %v178_v6 }
  0x4c   :  { %807 = vmatpush1.bf16.msra.mxu1 %v806_v44  ;;  %v157_v34 = vld [vmem:[#allocation5 + $0x370] sm:$0xff]  ;;  %v758_v35 = vpack.c.bf16 %v147_v28, %v143_v27  ;;  %v162_v36 = vld [vmem:[#allocation5 + $0x398] sm:$0xff]  ;;  %v760_v38 = vpack.c.bf16 %v156_v31, %v152_v30  ;;  %v151_v39 = vld [vmem:[#allocation5 + $0x340] sm:$0xff] }
  0x4d   :  { %809 = vmatprep.subr.bf16.mxu1 %v808_v47  ;;  %743 = vmatpush1.bf16.msra.mxu0 %v742_v50  ;;  %v166_v37 = vld [vmem:[#allocation5 + $0x3b8] sm:$0xff]  ;;  %v155_v40 = vld [vmem:[#allocation5 + $0x360] sm:$0xff]  ;;  %v826_v41 = vpack.c.bf16 %v157_v34, %v153_v33  ;;  %v160_v42 = vld [vmem:[#allocation5 + $0x388] sm:$0xff] }
  0x4e   :  { %745 = vmatprep.subr.bf16.mxu0 %v744_v53  ;;  %v164_v43 = vld [vmem:[#allocation5 + $0x3a8] sm:$0xff]  ;;  %v828_v44 = vpack.c.bf16 %v166_v37, %v162_v36  ;;  %v161_v45 = vld [vmem:[#allocation5 + $0x390] sm:$0xff]  ;;  %v762_v47 = vpack.c.bf16 %v155_v40, %v151_v39  ;;  %v170_v48 = vld [vmem:[#allocation5 + $0x3d8] sm:$0xff] }
  0x4f   :  { %v165_v46 = vld [vmem:[#allocation5 + $0x3b0] sm:$0xff]  ;;  %v174_v49 = vld [vmem:[#allocation5 + $0x3f8] sm:$0xff]  ;;  %v764_v50 = vpack.c.bf16 %v164_v43, %v160_v42  ;;  %v159_v51 = vld [vmem:[#allocation5 + $0x380] sm:$0xff] }
  0x50   :  { %811 = vmatpush1.bf16.msra.mxu1 %v810_v56  ;;  %v163_v52 = vld [vmem:[#allocation5 + $0x3a0] sm:$0xff]  ;;  %v830_v53 = vpack.c.bf16 %v165_v46, %v161_v45  ;;  %v168_v54 = vld [vmem:[#allocation5 + $0x3c8] sm:$0xff]  ;;  %v832_v56 = vpack.c.bf16 %v174_v49, %v170_v48  ;;  %v169_v57 = vld [vmem:[#allocation5 + $0x3d0] sm:$0xff] }
  0x51   :  { %813 = vmatprep.subr.bf16.mxu1 %v812_v59  ;;  %747 = vmatpush1.bf16.msra.mxu0 %v746_v62  ;;  %v172_v55 = vld [vmem:[#allocation5 + $0x3e8] sm:$0xff]  ;;  %v173_v58 = vld [vmem:[#allocation5 + $0x3f0] sm:$0xff]  ;;  %v766_v59 = vpack.c.bf16 %v163_v52, %v159_v51  ;;  %v167_v61 = vld [vmem:[#allocation5 + $0x3c0] sm:$0xff] }
  0x52   :  { %749 = vmatprep.subr.bf16.mxu0 %v748_v1  ;;  %v768_v60 = vpack.c.bf16 %v172_v55, %v168_v54  ;;  %v171_v62 = vld [vmem:[#allocation5 + $0x3e0] sm:$0xff]  ;;  %v834_v63 = vpack.c.bf16 %v173_v58, %v169_v57  ;;  %v46_v2 = vld [vmem:[#allocation2 + $0x18] sm:$0xff]  ;;  %v45_v3 = vld [vmem:[#allocation2 + $0x10] sm:$0xff] }
  0x53   :  { %v770_v0 = vpack.c.bf16 %v171_v62, %v167_v61  ;;  %v43_v1 = vld [vmem:[#allocation2] sm:$0xff] }
  0x54   :  { %815 = vmatpush1.bf16.msra.mxu1 %v814_v4  ;;  %v931_v4 = vmov 0.0   ;;  %v175_v8 = vld [vmem:[%s1007_s2] sm:$0xf]  ;;  %s933_s2 = smov [#allocation7]  }
  0x55   :  { %817 = vmatprep.subr.bf16.mxu1 %v816_v7  ;;  %751 = vmatpush1.bf16.msra.mxu0 %v750_v11  ;;  %v191_v7 = vsub.s32 3, %v178_v6  ;;  %v183_v11 = vsub.s32 1, %v178_v6  ;;  %v188_v13 = vrot.slane %v175_v8, %v187_v9  ;;  %s679_s13 = sshll.u32 %s933_s2, 4  ;;  %s680_s13 = int_to_ptr.vmem [resolvable:$true] %s679_s13 }
  0x56   :  { %753 = vmatprep.subr.bf16.mxu0 %v752_v14  ;;  %v180_v14 = vrot.slane %v175_v8, %v179_v10  ;;  %s897_s14 = scalar_lea.vmem %s680_s13, 512  ;;  %p902_p3 = scmp.lt.s32.totalorder %s680_s13, %s680_s13 }
  0x57   :  { %v192_v12 = vrot.slane %v175_v8, %v191_v7  ;;  %v184_v16 = vrot.slane %v175_v8, %v183_v11  ;;  %p898_p2 = scmp.ne.s32.totalorder %s680_s13, %s897_s14  ;;  %p903_p4 = scmp.lt.s32.totalorder %s897_s14, %s897_s14 }
  0x58   :  { %819 = vmatpush1.bf16.msra.mxu1 %v818_v17 }
  0x59   :  { %821 = vmatprep.subr.bf16.mxu1 %v820_v20  ;;  %755 = vmatpush1.bf16.msra.mxu0 %v754_v23  ;;  %p904_p5 = por %p903_p4, %p902_p3 }
  0x5a   :  { %757 = vmatprep.subr.bf16.mxu0 %v756_v26 }
  0x5b   :  { %p905_p6 = pnand %p904_p5, %p898_p2 }
  0x5c   :  { %823 = vmatpush1.bf16.msra.mxu1 %v822_v29 }
  0x5d   :  { %825 = vmatprep.subr.bf16.mxu1 %v824_v32  ;;  %759 = vmatpush1.bf16.msra.mxu0 %v758_v35 }
  0x5e   :  { %761 = vmatprep.subr.bf16.mxu0 %v760_v38 }
  0x60   :  { %827 = vmatpush1.bf16.msra.mxu1 %v826_v41 }
  0x61   :  { %829 = vmatprep.subr.bf16.mxu1 %v828_v44  ;;  %763 = vmatpush1.bf16.msra.mxu0 %v762_v47 }
  0x62   :  { %765 = vmatprep.subr.bf16.mxu0 %v764_v50 }
  0x64   :  { %831 = vmatpush1.bf16.msra.mxu1 %v830_v53 }
  0x65   :  { %833 = vmatprep.subr.bf16.mxu1 %v832_v56  ;;  %767 = vmatpush1.bf16.msra.mxu0 %v766_v59 }
  0x66   :  { %769 = vmatprep.subr.bf16.mxu0 %v768_v60 }
  0x68   :  { %835 = vmatpush1.bf16.msra.mxu1 %v834_v63 }
  0x69   :  { %771 = vmatpush1.bf16.msra.mxu0 %v770_v0  ;;  %703 = vmatprep.subr.mxu1 %v931_v4 }
  0x6a   :  { %698 = vmatprep.subr.mxu0 %v931_v4 }
  0x6b   :  { %339 = vmatmul.mubr.f32.vlgmr.msra.gmra.mrb[0].mxu1 %v43_v1 }
  0x6c   :  { %344 = vmatprep.mubr.f32.mxu1 %v46_v2  ;;  %262 = vmatmul.mubr.f32.vlgmr.msra.gmra.mrb[0].mxu0 %v43_v1 }
  0x6d   :  { %267 = vmatprep.mubr.f32.mxu0 %v46_v2 }
  0x6f   :  { %345 = vmatmul.mubr.f32.gmra.mrb[2].mxu1 %v45_v3 }
  0x70   :  { %268 = vmatmul.mubr.f32.gmra.mrb[2].mxu0 %v45_v3  ;;  %705 = vmatprep.mubr.msk.f32.mxu1 %vm932_vm0, %v931_v4 }
  0x71   :  { %700 = vmatprep.mubr.msk.f32.mxu0 %vm932_vm0, %v931_v4 }
 0x13e   :  { %v340_v15 = vpop.f32.mrb[0].mxu1 }
 0x13f   :  { %v342_v17 = vpop.f32.mrb[1].mxu1  ;;  %v263_v19 = vpop.f32.mrb[0].mxu0  ;;  %v341_v20 = vadd.f32 %v340_v15, %v188_v13 }
 0x140   :  { %v343_v18 = vadd.f32 %v342_v17, %v192_v12  ;;  %v264_v21 = vadd.f32 %v263_v19, %v180_v14  ;;  %v265_v22 = vpop.f32.mrb[1].mxu0 }
 0x141   :  { %v266_v24 = vadd.f32 %v265_v22, %v184_v16 }
 0x142   :  { %v346_v23 = vpop.f32.mrb[2].mxu1  ;;  %699 = vmatpush3.xpose.msra.mxu0 %v343_v18 }
 0x143   :  { %v348_v25 = vpop.f32.mrb[3].mxu1  ;;  %513 = vmatprep.subr.mxu0 %v341_v20  ;;  %v269_v27 = vpop.f32.mrb[2].mxu0  ;;  %v347_v28 = vadd.f32 %v346_v23, %v188_v13 }
 0x144   :  { %v349_v26 = vadd.f32 %v348_v25, %v192_v12  ;;  %v270_v29 = vadd.f32 %v269_v27, %v180_v14  ;;  %v271_v30 = vpop.f32.mrb[3].mxu0 }
 0x145   :  { %701 = vmatmul.mubr.f32.vlgmr.msra.gmra.mrb[4].mxu0 %v264_v21  ;;  %v272_v31 = vadd.f32 %v271_v30, %v184_v16 }
 0x146   :  { %704 = vmatpush3.xpose.msra.mxu1 %v349_v26  ;;  %514 = vmatpush1.msra.mxu0 %v266_v24 }
 0x147   :  { %587 = vmatprep.subr.mxu1 %v347_v28  ;;  %577 = vmatprep.mubr.f32.mxu0 %v931_v4 }
 0x149   :  { %706 = vmatmul.mubr.f32.vlgmr.msra.gmra.mrb[4].mxu1 %v270_v29 }
 0x14a   :  { %588 = vmatpush1.msra.mxu1 %v272_v31  ;;  %651 = vmatprep.mubr.f32.mxu1 %v931_v4 }
 0x218   :  { %v417_v32 = vpop.f32.mrb[4].mxu0 }
 0x219   :  { %v492_v33 = vsel %vm491_vm1, %v417_v32, -inf  ;;  %v702_v34 = vpop.f32.mrb[5].mxu0 }
 0x21a   :  { %493 = vmax.xlane.f32.xlu0 %v492_v33 }
 0x21c   :  { %v487_v35 = vpop.f32.mrb[4].mxu1 }
 0x21d   :  { %v495_v36 = vsel %vm491_vm1, %v487_v35, -inf  ;;  %v707_v37 = vpop.f32.mrb[5].mxu1 }
 0x21e   :  { %496 = vmax.xlane.f32.xlu0 %v495_v36 }
 0x2a7   :  { %v494_v38 = vpop.xlane.xlu0 %493 }
 0x2a8   :  { %v498_v39 = vsub.f32 %v417_v32, %v494_v38 }
 0x2aa   :  { %v500_v40 = vmul.f32 1.442695, %v498_v39 }
 0x2ab   :  { %v497_v41 = vpop.xlane.xlu0 %496 }
 0x2ac   :  { %845 = vpow2.f32 %v500_v40  ;;  %v499_v42 = vsub.f32 %v487_v35, %v497_v41 }
 0x2ae   :  { %v502_v43 = vmul.f32 1.442695, %v499_v42 }
 0x2b0   :  { %847 = vpow2.f32 %v502_v43 }
 0x2b6   :  { %v846_v44 = vpop.eup %845 }
 0x2b7   :  { %692 = vmatmul.mubr.msk.f32.vlgmr.msra.gmra.mrb[6].mxu0 %vm491_vm1, %v846_v44  ;;  %v504_v45 = vsel %vm491_vm1, %v846_v44, 0.0 }
 0x2b8   :  { %505 = vadd.xlane.f32.xlu1 %v504_v45 }
 0x2ba   :  { %v848_v46 = vpop.eup %847 }
 0x2bb   :  { %693 = vmatmul.mubr.msk.f32.vlgmr.msra.gmra.mrb[6].mxu1 %vm491_vm1, %v848_v46  ;;  %v507_v47 = vsel %vm491_vm1, %v848_v46, 0.0 }
 0x2bc   :  { %508 = vadd.xlane.f32.xlu1 %v507_v47 }
 0x345   :  { %v506_v48 = vpop.xlane.xlu1 %505 }
 0x346   :  { %849 = vrcp.f32 %v506_v48 }
 0x349   :  { %v509_v49 = vpop.xlane.xlu1 %508 }
 0x34a   :  { %851 = vrcp.f32 %v509_v49 }
 0x350   :  { %v850_v50 = vpop.eup %849 }
 0x354   :  { %v852_v56 = vpop.eup %851 }
 0x38a   :  { %v579_v51 = vpop.f32.mrb[6].mxu0 }
 0x38b   :  { %v662_v52 = vmul.f32 %v850_v50, %v579_v51  ;;  %v581_v53 = vpop.f32.mrb[7].mxu0 }
 0x38c   :  { %v663_v54 = vmul.f32 %v850_v50, %v581_v53 }
 0x38d   :  { %v666_v55 = vadd.f32 %v662_v52, %v266_v24 }
 0x38e   :  { %v667_v57 = vadd.f32 %v663_v54, %v341_v20  ;;  %v653_v58 = vpop.f32.mrb[6].mxu1 }
 0x38f   :  { %670 = vst [vmem:[#allocation7] sm:$0xff] %v666_v55  ;;  %v664_v59 = vmul.f32 %v852_v56, %v653_v58  ;;  %v655_v60 = vpop.f32.mrb[7].mxu1 }
 0x390   :  { %671 = vst [vmem:[#allocation7 + $0x8] sm:$0xff] %v667_v57  ;;  %v665_v61 = vmul.f32 %v852_v56, %v655_v60 }
 0x391   :  { %v668_v62 = vadd.f32 %v664_v59, %v272_v31 }
 0x392   :  { %v669_v63 = vadd.f32 %v665_v61, %v347_v28 }
 0x393   :  { %672 = vst [vmem:[#allocation7 + $0x10] sm:$0xff] %v668_v62 }
 0x394   :  { %673 = vst [vmem:[#allocation7 + $0x18] sm:$0xff] %v669_v63 }
 0x395   :  { %908 = shalt.err (!%p905_p6)
}
 0x396   :  { %s909_s17 = scalar_lea.hbm %s1008_s3, 512 }
 0x397   :  { %p910_p7 = scmp.ne.s32.totalorder %s1008_s3, %s909_s17  ;;  %p913_p8 = scmp.lt.u32.totalorder %s909_s17, %s1008_s3 }
 0x399   :  { %p915_p9 = pnand %p913_p8, %p910_p7 }
 0x39b   :  { %918 = shalt.err (!%p915_p9)
}
 0x39c   :  { %685 = dma.vmem_to_hbm [thread:$0]  %s680_s13, 512, %s1008_s3, [#allocation4], %s926_s22, %s926_s22, %s927_s23  }
 0x39d   :  { %923 = dma.done.wait [#allocation4], 512  }
 0x39e   :  { %924 = vsyncadd [#allocation4], 4294966784 }
 0x39f   :  { %689 = vsyncpa [#allocation3], 1 }
 0x3a0   :  { %690 = vsyncpa [#allocation6], 1 }
 0x3a1   :  { %691 = vsyncpa [#allocation4], 1 }

</bundles_post_ra>
